<compile_context>
chip_gen: v7x
topology: tpu7x:2x2x1
jax: 0.10.0
libtpu: 0.0.40
codegen_flags: <defaults>
</compile_context>

<pallas_src>
import functools

import jax
import jax.numpy as jnp
from jax import lax
from jax.experimental import pallas as pl
from jax.experimental.pallas import tpu as pltpu


def _round_up(x: int, m: int) -> int:
    return (x + m - 1) // m * m


def _softplus(x):
    # Numerically stable softplus: max(x, 0) + log1p(exp(-|x|))
    return jnp.maximum(x, 0.0) + jnp.log1p(jnp.exp(-jnp.abs(x)))


def _to_f32(x):
    return x if x.dtype == jnp.float32 else x.astype(jnp.float32)


def _scalar_slab(pair_sum, ib_sum=None):
    # Lane-dense (8, 128) slab; wrapper reads [0, 0] (and [1, 0]).
    r = lax.broadcasted_iota(jnp.int32, (8, 128), 0)
    c = lax.broadcasted_iota(jnp.int32, (8, 128), 1)
    slab = jnp.where((r == 0) & (c == 0), pair_sum, 0.0)
    if ib_sum is not None:
        slab = jnp.where((r == 1) & (c == 0), ib_sum, slab)
    return slab


def _vmem_budget_bytes() -> int:
    cap = 64 << 20  # conservative fallback (v7x per-TC VMEM)
    try:
        info = pltpu.get_tpu_info()
        cap = int(getattr(info, "vmem_capacity_bytes", cap))
    except Exception:
        pass
    return int(cap * 0.7)


# ---------------------------------------------------------------------------
# Kernel 1: pairwise term only (HBM-bound elementwise path, 1-D grid).
# ---------------------------------------------------------------------------
def _pairwise_kernel(q_ref, d_ref, nd_ref, out_ref, *,
                     batch: int, tile_rows: int, mask_rows: bool):
    qf = _to_f32(q_ref[...])
    pos = jnp.sum(qf * _to_f32(d_ref[...]), axis=-1, keepdims=True)
    neg = jnp.sum(qf * _to_f32(nd_ref[...]), axis=-1, keepdims=True)
    vals = _softplus(neg - pos)
    if mask_rows:
        row = (pl.program_id(0) * tile_rows
               + lax.broadcasted_iota(jnp.int32, (tile_rows, 1), 0))
        vals = jnp.where(row < batch, vals, 0.0)
    out_ref[0] = _scalar_slab(jnp.sum(vals))


# ---------------------------------------------------------------------------
# Kernel 2: pairwise + in-batch term (2-D grid, online row-max over doc tiles).
# ---------------------------------------------------------------------------
def _inbatch_kernel(q_ref, dt_ref, nd_ref, out_ref, m_sc, pos_sc, *,
                    batch: int, tb: int, td: int,
                    mask_rows: bool, mask_cols: bool):
    i = pl.program_id(0)            # batch tile
    j = pl.program_id(1)            # doc tile

    @pl.when(j == 0)
    def _init():
        m_sc[...] = jnp.full(m_sc.shape, -1e30, dtype=jnp.float32)
        pos_sc[...] = jnp.zeros(pos_sc.shape, dtype=jnp.float32)

    q = q_ref[...]                                   # (tb, D), native dtype
    # scores[r, c] = <q_r, d_c> ; docs pre-transposed to (D, td): canonical MXU.
    scores = lax.dot_general(q, dt_ref[...],
                             dimension_numbers=(((1,), (0,)), ((), ())),
                             preferred_element_type=jnp.float32)  # (tb, td)

    col = j * td + lax.broadcasted_iota(jnp.int32, (1, td), 1)    # (1, td)
    row = i * tb + lax.broadcasted_iota(jnp.int32, (tb, 1), 0)    # (tb, 1)
    diag = col == row                                             # (tb, td)

    # Reference semantics: penalize the diagonal by 1e6 before the row max.
    penalized = jnp.where(diag, scores - 1000000.0, scores)
    if mask_cols:  # ragged trailing doc tile: exclude garbage columns
        penalized = jnp.where(col < batch, penalized, -1e30)
    m_sc[...] = jnp.maximum(m_sc[...],
                            jnp.max(penalized, axis=-1, keepdims=True))

    # The diagonal of this batch tile only lives in doc tiles overlapping it.
    @pl.when((j * td < (i + 1) * tb) & ((j + 1) * td > i * tb))
    def _accum_diag():
        pos_sc[...] += jnp.sum(jnp.where(diag, scores, 0.0),
                               axis=-1, keepdims=True)

    @pl.when(j == pl.num_programs(1) - 1)
    def _finalize():
        pos = pos_sc[...]
        neg = jnp.sum(_to_f32(q) * _to_f32(nd_ref[...]),
                      axis=-1, keepdims=True)
        pair = _softplus(neg - pos)
        ib = _softplus(m_sc[...] - pos)
        if mask_rows:
            valid = row < batch
            pair = jnp.where(valid, pair, 0.0)
            ib = jnp.where(valid, ib, 0.0)
        out_ref[0] = _scalar_slab(jnp.sum(pair), jnp.sum(ib))


# ---------------------------------------------------------------------------
# Wrapper
# ---------------------------------------------------------------------------
def bi_pairwise_negative_ce_loss(query_embeddings,
                                 doc_embeddings,
                                 neg_doc_embeddings,
                                 in_batch_term: bool = False,
                                 tile_rows: int | None = None,
                                 doc_tile: int | None = None):
    """JAX/Pallas equivalent of BiPairwiseNegativeCELoss.forward. Returns scalar f32."""
    B, D = query_embeddings.shape
    isz = jnp.dtype(query_embeddings.dtype).itemsize
    budget = _vmem_budget_bytes()

    # ------------------------------------------------------------------ #
    # Path A: pairwise term only (1-D grid, memory bound).
    # ------------------------------------------------------------------ #
    if not in_batch_term:
        if tile_rows is None:
            tb = (budget - (2 << 20)) // max(1, 6 * D * isz)  # 3 inputs x 2 bufs
            tb = max(8, min(2048, (tb // 8) * 8))
        else:
            tb = max(8, _round_up(tile_rows, 8))
        if tb >= B:
            tb = B                       # single full-extent tile (any B)
        num_tiles = pl.cdiv(B, tb)
        mask_rows = (B % tb) != 0

        need = 6 * tb * D * isz + 2 * 8 * 128 * 4 + (2 << 20)
        vmem_limit = int(min(budget, max(need, 16 << 20)))
        cost = pl.CostEstimate(
            flops=4 * B * D, transcendentals=2 * B,
            bytes_accessed=3 * B * D * isz + num_tiles * 8 * 128 * 4)

        kernel = functools.partial(_pairwise_kernel, batch=B, tile_rows=tb,
                                   mask_rows=mask_rows)
        tile_spec = pl.BlockSpec((tb, D), lambda i: (i, 0))
        partial = pl.pallas_call(
            kernel,
            out_shape=jax.ShapeDtypeStruct((num_tiles, 8, 128), jnp.float32),
            grid=(num_tiles,),
            in_specs=[tile_spec, tile_spec, tile_spec],
            out_specs=pl.BlockSpec((1, 8, 128), lambda i: (i, 0, 0)),
            compiler_params=pltpu.CompilerParams(
                dimension_semantics=("parallel",),
                vmem_limit_bytes=vmem_limit),
            cost_estimate=cost,
        )(query_embeddings, doc_embeddings, neg_doc_embeddings)

        loss = jnp.sum(partial[:, 0, 0]) / B
        return loss / 2.0

    # ------------------------------------------------------------------ #
    # Path B: pairwise + in-batch term (2-D grid, online row-max).
    # ------------------------------------------------------------------ #
    dt_full = jnp.transpose(doc_embeddings)      # (D, B): one-time transpose

    if tile_rows is None:
        tb = 256
    else:
        tb = max(8, _round_up(tile_rows, 8))
    if tb >= B:
        tb = B
    if doc_tile is None:
        td = B if B <= 512 else 512
    else:
        td = B if doc_tile >= B else max(128, _round_up(doc_tile, 128))
        if td >= B:
            td = B

    def need_bytes(tb_, td_):
        return (4 * tb_ * D * isz        # q + neg-doc tiles, double buffered
                + 2 * D * td_ * isz      # doc tile, double buffered
                + 3 * tb_ * td_ * 4      # f32 score-tile temporaries
                + 4 * tb_ * 4            # scratch accumulators
                + 2 * 8 * 128 * 4
                + (2 << 20))

    # Shrink tiles until they fit this generation's VMEM budget.
    while need_bytes(tb, td) > budget:
        if td % 128 == 0 and td > 128 and td >= tb:
            td //= 2
        elif tb > 8:
            tb = max(8, (tb // 2) // 8 * 8)
        else:
            break

    n_i = pl.cdiv(B, tb)
    n_j = pl.cdiv(B, td)
    mask_rows = (B % tb) != 0
    mask_cols = (B % td) != 0

    vmem_limit = int(min(budget, max(need_bytes(tb, td), 16 << 20)))
    cost = pl.CostEstimate(
        flops=2 * B * B * D + 2 * B * D,
        transcendentals=4 * B,
        bytes_accessed=(2 + n_i) * B * D * isz + n_i * 8 * 128 * 4)

    kernel = functools.partial(_inbatch_kernel, batch=B, tb=tb, td=td,
                               mask_rows=mask_rows, mask_cols=mask_cols)
    partial = pl.pallas_call(
        kernel,
        out_shape=jax.ShapeDtypeStruct((n_i, 8, 128), jnp.float32),
        grid=(n_i, n_j),
        in_specs=[
            pl.BlockSpec((tb, D), lambda i, j: (i, 0)),   # queries
            pl.BlockSpec((D, td), lambda i, j: (0, j)),   # docs (transposed)
            pl.BlockSpec((tb, D), lambda i, j: (i, 0)),   # negative docs
        ],
        out_specs=pl.BlockSpec((1, 8, 128), lambda i, j: (i, 0, 0)),
        scratch_shapes=[pltpu.VMEM((tb, 1), jnp.float32),   # running row max
                        pltpu.VMEM((tb, 1), jnp.float32)],  # diagonal (pos)
        compiler_params=pltpu.CompilerParams(
            dimension_semantics=("parallel", "arbitrary"),
            vmem_limit_bytes=vmem_limit),
        cost_estimate=cost,
    )(query_embeddings, dt_full, neg_doc_embeddings)

    pair_total = jnp.sum(partial[:, 0, 0])
    ib_total = jnp.sum(partial[:, 1, 0])
    return (pair_total / B + ib_total / B) / 2.0


# ---------------------------------------------------------------------------
# Pure-JAX reference (mirrors the PyTorch module)
# ---------------------------------------------------------------------------
def _reference_loss(q, d, nd, in_batch_term=False):
    hp = jax.lax.Precision.HIGHEST
    pos = jnp.einsum('bd,cd->bc', q, d, precision=hp).diagonal()
    neg = jnp.einsum('bd,cd->bc', q, nd, precision=hp).diagonal()
    loss = jnp.mean(jax.nn.softplus(neg - pos))
    if in_batch_term:
        scores = jnp.einsum('bd,cd->bc', q, d, precision=hp)
        pos_s = scores.diagonal()
        neg_s = jnp.max(scores - jnp.eye(scores.shape[0],
                                         dtype=scores.dtype) * 1000000.0, axis=1)
        loss = loss + jnp.mean(jax.nn.softplus(neg_s - pos_s))
    return loss / 2.0


if __name__ == "__main__":
    # Case 1: canonical tiny shapes, default tiling, both branches.
    kq, kd, kn = jax.random.split(jax.random.PRNGKey(0), 3)
    B, D = 8, 32
    q = jax.random.normal(kq, (B, D), dtype=jnp.float32)
    d = jax.random.normal(kd, (B, D), dtype=jnp.float32)
    nd = jax.random.normal(kn, (B, D), dtype=jnp.float32)
    for ib in (False, True):
        out = bi_pairwise_negative_ce_loss(q, d, nd, in_batch_term=ib)
        jax.block_until_ready(out)
        ref = _reference_loss(q, d, nd, in_batch_term=ib)
        assert jnp.allclose(out, ref, atol=1e-5, rtol=1e-5), (ib, out, ref)

    # Case 2: non-divisible batch, forced multi-tile batch axis (ragged last
    # tile exercises row masking in both kernels).
    kq2, kd2, kn2 = jax.random.split(jax.random.PRNGKey(1), 3)
    B2, D2 = 13, 32
    q2 = jax.random.normal(kq2, (B2, D2), dtype=jnp.float32)
    d2 = jax.random.normal(kd2, (B2, D2), dtype=jnp.float32)
    nd2 = jax.random.normal(kn2, (B2, D2), dtype=jnp.float32)
    for ib in (False, True):
        out2 = bi_pairwise_negative_ce_loss(q2, d2, nd2, in_batch_term=ib,
                                            tile_rows=8)
        jax.block_until_ready(out2)
        ref2 = _reference_loss(q2, d2, nd2, in_batch_term=ib)
        assert jnp.allclose(out2, ref2, atol=1e-5, rtol=1e-5), (ib, out2, ref2)

    # Case 3: multi-tile on BOTH axes — exercises the online row-max across
    # doc tiles, ragged doc columns, and the diagonal-overlap gating.
    kq3, kd3, kn3 = jax.random.split(jax.random.PRNGKey(2), 3)
    B3, D3 = 300, 64
    q3 = jax.random.normal(kq3, (B3, D3), dtype=jnp.float32)
    d3 = jax.random.normal(kd3, (B3, D3), dtype=jnp.float32)
    nd3 = jax.random.normal(kn3, (B3, D3), dtype=jnp.float32)
    for ib in (False, True):
        out3 = bi_pairwise_negative_ce_loss(q3, d3, nd3, in_batch_term=ib,
                                            tile_rows=128, doc_tile=128)
        jax.block_until_ready(out3)
        ref3 = _reference_loss(q3, d3, nd3, in_batch_term=ib)
        assert jnp.allclose(out3, ref3, atol=1e-3, rtol=1e-3), (ib, out3, ref3)

    print("KERNEL_OK")
</pallas_src>

<mosaic_0001>
module attributes {stable_mosaic.version = 11 : i64} {
  func.func @_pairwise_kernel(%arg0: i32, %arg1: memref<8x32xf32, #tpu.memory_space<vmem>>, %arg2: memref<8x32xf32, #tpu.memory_space<vmem>>, %arg3: memref<8x32xf32, #tpu.memory_space<vmem>>, %arg4: memref<1x8x128xf32, #tpu.memory_space<vmem>>) attributes {dimension_semantics = [#tpu.dimension_semantics<parallel>], iteration_bounds = array<i64: 1>, scalar_prefetch = 0 : i64, scratch_operands = 0 : i64, tpu.core_type = #tpu.core_type<tc>, window_params = [{transform_indices = @transform_0, window_bounds = array<i64: 8, 32>}, {transform_indices = @transform_1, window_bounds = array<i64: 8, 32>}, {transform_indices = @transform_2, window_bounds = array<i64: 8, 32>}, {transform_indices = @transform_3, window_bounds = array<i64: 1, 8, 128>}]} {
    %c0 = arith.constant 0 : index
    %c0_0 = arith.constant 0 : index
    %0 = vector.load %arg1[%c0, %c0_0] : memref<8x32xf32, #tpu.memory_space<vmem>>, vector<8x32xf32>
    %c0_1 = arith.constant 0 : index
    %c0_2 = arith.constant 0 : index
    %1 = vector.load %arg2[%c0_1, %c0_2] : memref<8x32xf32, #tpu.memory_space<vmem>>, vector<8x32xf32>
    %2 = arith.mulf %0, %1 : vector<8x32xf32>
    %cst = arith.constant dense<0.000000e+00> : vector<8xf32>
    %3 = vector.multi_reduction <add>, %2, %cst [1] : vector<8x32xf32> to vector<8xf32>
    %4 = vector.shape_cast %3 : vector<8xf32> to vector<8x1xf32>
    %c0_3 = arith.constant 0 : index
    %c0_4 = arith.constant 0 : index
    %5 = vector.load %arg3[%c0_3, %c0_4] : memref<8x32xf32, #tpu.memory_space<vmem>>, vector<8x32xf32>
    %6 = arith.mulf %0, %5 : vector<8x32xf32>
    %cst_5 = arith.constant dense<0.000000e+00> : vector<8xf32>
    %7 = vector.multi_reduction <add>, %6, %cst_5 [1] : vector<8x32xf32> to vector<8xf32>
    %8 = vector.shape_cast %7 : vector<8xf32> to vector<8x1xf32>
    %9 = arith.subf %8, %4 : vector<8x1xf32>
    %cst_6 = arith.constant 0.000000e+00 : f32
    %10 = vector.broadcast %cst_6 : f32 to vector<8x1xf32>
    %11 = arith.maximumf %9, %10 : vector<8x1xf32>
    %12 = math.absf %9 : vector<8x1xf32>
    %cst_7 = arith.constant 0.000000e+00 : f32
    %13 = vector.broadcast %cst_7 : f32 to vector<8x1xf32>
    %14 = arith.subf %13, %12 : vector<8x1xf32>
    %15 = math.exp %14 : vector<8x1xf32>
    %16 = math.log1p %15 : vector<8x1xf32>
    %17 = arith.addf %11, %16 : vector<8x1xf32>
    %18 = vector.shape_cast %17 : vector<8x1xf32> to vector<1x8x1xf32>
    %cst_8 = arith.constant dense<0.000000e+00> : vector<1xf32>
    %19 = vector.multi_reduction <add>, %18, %cst_8 [1, 2] : vector<1x8x1xf32> to vector<1xf32>
    %20 = vector.shape_cast %19 : vector<1xf32> to vector<1x1x1xf32>
    %21 = vector.extract %20[0, 0, 0] : f32 from vector<1x1x1xf32>
    %22 = tpu.iota {dimensions = array<i32: 0>} : vector<8x128xi32>
    %23 = tpu.iota {dimensions = array<i32: 1>} : vector<8x128xi32>
    %c0_i32 = arith.constant 0 : i32
    %24 = vector.broadcast %c0_i32 : i32 to vector<8x128xi32>
    %25 = arith.cmpi eq, %22, %24 : vector<8x128xi32>
    %c0_i32_9 = arith.constant 0 : i32
    %26 = vector.broadcast %c0_i32_9 : i32 to vector<8x128xi32>
    %27 = arith.cmpi eq, %23, %26 : vector<8x128xi32>
    %28 = arith.andi %25, %27 : vector<8x128xi1>
    %cst_10 = arith.constant 0.000000e+00 : f32
    %29 = vector.broadcast %21 : f32 to vector<8x128xf32>
    %30 = vector.broadcast %cst_10 : f32 to vector<8x128xf32>
    %31 = arith.select %28, %29, %30 : vector<8x128xi1>, vector<8x128xf32>
    %c0_11 = arith.constant 0 : index
    %c0_12 = arith.constant 0 : index
    %c0_13 = arith.constant 0 : index
    %32 = vector.load %arg4[%c0_11, %c0_12, %c0_13] : memref<1x8x128xf32, #tpu.memory_space<vmem>>, vector<1x8x128xf32>
    %33 = vector.shape_cast %32 : vector<1x8x128xf32> to vector<8x128xf32>
    %34 = vector.shape_cast %31 : vector<8x128xf32> to vector<1x8x128xf32>
    tpu.vector_store %arg4[%c0_11, %c0_12, %c0_13], %34 {strides = array<i32>} : memref<1x8x128xf32, #tpu.memory_space<vmem>>, vector<1x8x128xf32>,
    return
  }
  func.func @transform_0(%arg0: i32) -> (i32, i32) {
    %c0_i32 = arith.constant 0 : i32
    %c0_i32_0 = arith.constant 0 : i32
    return %arg0, %c0_i32 : i32, i32
  }
  func.func @transform_1(%arg0: i32) -> (i32, i32) {
    %c0_i32 = arith.constant 0 : i32
    %c0_i32_0 = arith.constant 0 : i32
    return %arg0, %c0_i32 : i32, i32
  }
  func.func @transform_2(%arg0: i32) -> (i32, i32) {
    %c0_i32 = arith.constant 0 : i32
    %c0_i32_0 = arith.constant 0 : i32
    return %arg0, %c0_i32 : i32, i32
  }
  func.func @transform_3(%arg0: i32) -> (i32, i32, i32) {
    %c0_i32 = arith.constant 0 : i32
    %c0_i32_0 = arith.constant 0 : i32
    %c0_i32_1 = arith.constant 0 : i32
    return %arg0, %c0_i32, %c0_i32_0 : i32, i32, i32
  }
}

</mosaic_0001>

<bundles_post_ra>
// kernel: tpu_custom_call.1
= control target key start
LH: loop header
LB: loop body
LE: loop exit
PB: predicated region body
PF: predicated region fallthrough
CT: control target
= control target key end

     0   :  { %8 = vsyncpa [#allocation3], 0  ;;  %s291_s0 = inlined_call_operand.hbm [shape: f32[8,32], index: 0, kind: input, shape index: {}]   ;;  %s292_s1 = inlined_call_operand.hbm [shape: f32[8,32], index: 1, kind: input, shape index: {}]   ;;  %s293_s2 = inlined_call_operand.hbm [shape: f32[8,32], index: 2, kind: input, shape index: {}]   ;;  %s294_s3 = inlined_call_operand.hbm [shape: f32[1,8,128], index: 3, kind: output, shape index: {}]  }
   0x1   :  { %9 = vsyncpa [#allocation6], 0 }
   0x2   :  { %10 = vsyncpa [#allocation4], 0  ;;  %s219_s12 = smov [#allocation5]   ;;  %s220_s14 = smov [#allocation2]  }
   0x3   :  { %s27_s13 = sshll.u32 %s219_s12, 4  ;;  %s17_s15 = sshll.u32 %s220_s14, 4  ;;  %s28_s13 = int_to_ptr.vmem [resolvable:$true] %s27_s13  ;;  %s18_s15 = int_to_ptr.vmem [resolvable:$true] %s17_s15 }
   0x4   :  { %s125_s18 = scalar_lea.hbm %s292_s1, 128 }
   0x5   :  { %p126_p0 = scmp.ne.s32.totalorder %s292_s1, %s125_s18  ;;  %p129_p1 = scmp.lt.u32.totalorder %s125_s18, %s292_s1 }
   0x7   :  { %p131_p2 = pnand %p129_p1, %p126_p0 }
   0x9   :  { %134 = shalt.err (!%p131_p2)
}
   0xa   :  { %s135_s23 = scalar_lea.vmem %s28_s13, 128  ;;  %p140_p4 = scmp.lt.s32.totalorder %s28_s13, %s28_s13 }
   0xb   :  { %p136_p3 = scmp.ne.s32.totalorder %s28_s13, %s135_s23  ;;  %p141_p5 = scmp.lt.s32.totalorder %s135_s23, %s135_s23 }
   0xd   :  { %p142_p6 = por %p141_p5, %p140_p4 }
   0xf   :  { %p143_p7 = pnand %p142_p6, %p136_p3 }
  0x11   :  { %146 = shalt.err (!%p143_p7)
}
  0x12   :  { %30 = dma.hbm_to_vmem [thread:$0]  %s292_s1, 128, %s28_s13, [#allocation6]  }
  0x13   :  { %s147_s28 = scalar_lea.hbm %s291_s0, 128 }
  0x14   :  { %p148_p8 = scmp.ne.s32.totalorder %s291_s0, %s147_s28  ;;  %p151_p9 = scmp.lt.u32.totalorder %s147_s28, %s291_s0 }
  0x16   :  { %p153_p10 = pnand %p151_p9, %p148_p8 }
  0x18   :  { %156 = shalt.err (!%p153_p10)
}
  0x19   :  { %s157_s6 = scalar_lea.vmem %s18_s15, 128  ;;  %p162_p12 = scmp.lt.s32.totalorder %s18_s15, %s18_s15 }
  0x1a   :  { %p158_p11 = scmp.ne.s32.totalorder %s18_s15, %s157_s6  ;;  %p163_p13 = scmp.lt.s32.totalorder %s157_s6, %s157_s6 }
  0x1c   :  { %p164_p0 = por %p163_p13, %p162_p12 }
  0x1e   :  { %p165_p1 = pnand %p164_p0, %p158_p11 }
  0x20   :  { %168 = shalt.err (!%p165_p1)
}
  0x21   :  { %20 = dma.hbm_to_vmem [thread:$0]  %s291_s0, 128, %s18_s15, [#allocation3]  }
  0x22   :  { %s221_s8 = smov [#allocation7]   ;;  %s169_s12 = scalar_lea.hbm %s293_s2, 128 }
  0x23   :  { %s37_s9 = sshll.u32 %s221_s8, 4  ;;  %p170_p2 = scmp.ne.s32.totalorder %s293_s2, %s169_s12  ;;  %s38_s9 = int_to_ptr.vmem [resolvable:$true] %s37_s9 }
  0x24   :  { %p173_p3 = scmp.lt.u32.totalorder %s169_s12, %s293_s2 }
  0x26   :  { %p175_p4 = pnand %p173_p3, %p170_p2 }
  0x28   :  { %178 = shalt.err (!%p175_p4)
}
  0x29   :  { %s179_s18 = scalar_lea.vmem %s38_s9, 128  ;;  %p184_p6 = scmp.lt.s32.totalorder %s38_s9, %s38_s9 }
  0x2a   :  { %p180_p5 = scmp.ne.s32.totalorder %s38_s9, %s179_s18  ;;  %p185_p7 = scmp.lt.s32.totalorder %s179_s18, %s179_s18 }
  0x2c   :  { %p186_p8 = por %p185_p7, %p184_p6 }
  0x2e   :  { %p187_p9 = pnand %p186_p8, %p180_p5 }
  0x30   :  { %190 = shalt.err (!%p187_p9)
}
  0x31   :  { %40 = dma.hbm_to_vmem [thread:$0]  %s293_s2, 128, %s38_s9, [#allocation6]  }
  0x32   :  { %213 = dma.done.wait [#allocation3], 128  }
  0x33   :  { %214 = vsyncadd [#allocation3], 4294967168 }
  0x34   :  { %215 = dma.done.wait [#allocation6], 256  }
  0x35   :  { %216 = vsyncadd [#allocation6], 4294967040  ;;  %v50_v0 = vld [vmem:[#allocation2] sm:$0xff]  ;;  %v51_v1 = vld [vmem:[#allocation5] sm:$0xff]  ;;  %vm53_vm0 = vcmask 261120   ;;  %vm78_vm2 = vcmask 7168   ;;  %v89_v32 = vlaneseq }
  0x36   :  { %v57_v2 = vld [vmem:[#allocation7] sm:$0xff]  ;;  %v52_v3 = vmul.f32 %v51_v1, %v50_v0  ;;  %s222_s2 = smov [#allocation8]  }
  0x37   :  { %v58_v4 = vmul.f32 %v57_v2, %v50_v0  ;;  %v90_v33 = vshrl.u32 %v89_v32, 7  ;;  %v92_v34 = vand.u32 127, %v89_v32  ;;  %s105_s19 = sshll.u32 %s222_s2, 4  ;;  %s106_s19 = int_to_ptr.vmem [resolvable:$true] %s105_s19 }
  0x38   :  { %v54_v5 = vsel %vm53_vm0, %v52_v3, 0.0  ;;  %s191_s21 = scalar_lea.vmem %s106_s19, 128  ;;  %p196_p11 = scmp.lt.s32.totalorder %s106_s19, %s106_s19 }
  0x39   :  { %55 = vadd.xlane.f32.xlu0 %v54_v5  ;;  %v59_v6 = vsel %vm53_vm0, %v58_v4, 0.0  ;;  %vm93_vm3 = vcmp.eq.s32.totalorder %v90_v33, 0  ;;  %vm94_vm4 = vcmp.eq.s32.totalorder %v92_v34, 0  ;;  %p192_p10 = scmp.ne.s32.totalorder %s106_s19, %s191_s21  ;;  %p197_p12 = scmp.lt.s32.totalorder %s191_s21, %s191_s21 }
  0x3a   :  { %vm95_vm5 = vmand %vm93_vm3, %vm94_vm4 }
  0x3b   :  { %p198_p13 = por %p197_p12, %p196_p11 }
  0x3d   :  { %60 = vadd.xlane.f32.xlu0 %v59_v6  ;;  %p199_p0 = pnand %p198_p13, %p192_p10 }
  0xc6   :  { %v56_v7 = vpop.xlane.xlu0 %55 }
  0xca   :  { %v61_v8 = vpop.xlane.xlu0 %60 }
  0xcb   :  { %v62_v9 = vsub.f32 %v61_v8, %v56_v7 }
  0xcd   :  { %v64_v10 = vand.u32 2147483647, %v62_v9  ;;  %v63_v21 = vmax.f32 %v62_v9, 0.0 }
  0xcf   :  { %v65_v11 = vsub.f32 0.0, %v64_v10 }
  0xd1   :  { %v66_v12 = vmul.f32 1.442695, %v65_v11 }
  0xd3   :  { %121 = vpow2.f32 %v66_v12 }
  0xdd   :  { %v122_v13 = vpop.eup %121 }
  0xde   :  { %v68_v14 = vadd.f32 1.0, %v122_v13  ;;  %v71_v15 = vmul.f32 -0.5, %v122_v13  ;;  %v74_v17 = vand.u32 2147483647, %v122_v13 }
  0xe0   :  { %123 = vlog2.f32 %v68_v14  ;;  %v72_v16 = vadd.f32 1.0, %v71_v15  ;;  %vm75_vm1 = vcmp.lt.f32.partialorder %v74_v17, 0.0004427343 }
  0xe2   :  { %v73_v20 = vmul.f32 %v122_v13, %v72_v16 }
  0xea   :  { %v124_v18 = vpop.eup %123 }
  0xeb   :  { %v70_v19 = vmul.f32 0.6931472, %v124_v18 }
  0xed   :  { %v76_v22 = vsel %vm75_vm1, %v73_v20, %v70_v19 }
  0xee   :  { %v77_v23 = vadd.f32 %v76_v22, %v63_v21 }
  0xf0   :  { %v79_v24 = vsel %vm78_vm2, %v77_v23, 0.0 }
  0xf1   :  { %80 = vadd.xlane.f32.xlu1 %v79_v24 }
 0x17e   :  { %v81_v25 = vpop.xlane.xlu1 %80 }
 0x17f   :  { %v82_v26 = vrot.slane %v81_v25, 4 }
 0x181   :  { %v83_v27 = vadd.f32 %v82_v26, %v81_v25 }
 0x183   :  { %v84_v28 = vrot.slane %v83_v27, 2 }
 0x185   :  { %v85_v29 = vadd.f32 %v84_v28, %v83_v27 }
 0x187   :  { %v86_v30 = vrot.slane %v85_v29, 1 }
 0x189   :  { %v87_v31 = vadd.f32 %v86_v30, %v85_v29 }
 0x18b   :  { %115 = vpush %v87_v31 }
 0x1bc   :  { %s116_s20 = spop %115 }
 0x1bd   :  { %v96_v35 = vstv %s116_s20 }
 0x1be   :  { %v97_v36 = vsel %vm95_vm5, %v96_v35, 0.0 }
 0x1bf   :  { %98 = vst [vmem:[#allocation8] sm:$0xff] %v97_v36 }
 0x1c0   :  { %202 = shalt.err (!%p199_p0)
}
 0x1c1   :  { %s203_s24 = scalar_lea.hbm %s294_s3, 128 }
 0x1c2   :  { %p204_p1 = scmp.ne.s32.totalorder %s294_s3, %s203_s24  ;;  %p207_p2 = scmp.lt.u32.totalorder %s203_s24, %s294_s3 }
 0x1c4   :  { %p209_p3 = pnand %p207_p2, %p204_p1 }
 0x1c6   :  { %212 = shalt.err (!%p209_p3)
}
 0x1c7   :  { %108 = dma.vmem_to_hbm [thread:$0]  %s106_s19, 128, %s294_s3, [#allocation4]  }
 0x1c8   :  { %217 = dma.done.wait [#allocation4], 128  }
 0x1c9   :  { %218 = vsyncadd [#allocation4], 4294967168 }
 0x1ca   :  { %112 = vsyncpa [#allocation3], 1 }
 0x1cb   :  { %113 = vsyncpa [#allocation6], 1 }
 0x1cc   :  { %114 = vsyncpa [#allocation4], 1 }

</bundles_post_ra>
